<compile_context>
chip_gen: v7x
topology: tpu7x:2x2x1
jax: 0.10.0
libtpu: 0.0.40
codegen_flags: <defaults>
</compile_context>

<pallas_src>
import jax
import jax.numpy as jnp
from jax.experimental import pallas as pl
from jax.experimental.pallas import tpu as pltpu


# ----------------------------------------------------------------------------
# Fused residual-block kernel (one batch element per grid step).
# Refs:
#   x_ref  : (C, H*W)     f32   input feature map (flattened spatial, lane-dense)
#   w1_ref : (C, K*K*C)   bf16  conv1 weight (BN1 scale folded in), tap-major
#   w2_ref : (C, K*K*C)   bf16  conv2 weight (BN2 scale folded in), tap-major
#   m_ref  : (K*K, H*W)   f32   0/1 zero-padding validity mask per tap
#   t1_ref : (C, 1)       f32   folded BN1 shift (conv1 bias included)
#   t2_ref : (C, 1)       f32   folded BN2 shift (conv2 bias included)
#   o_ref  : (C, H*W)     f32   output
# ----------------------------------------------------------------------------
def _make_resblock_kernel(C, HW, K, shifts):
    KK = K * K
    center = KK // 2
    assert shifts[center] == 0

    def kernel(x_ref, w1_ref, w2_ref, m_ref, t1_ref, t2_ref, o_ref):
        x = x_ref[...]                       # (C, HW) f32 — also the residual
        masks = m_ref[...]                   # (KK, HW) f32
        w1 = w1_ref[...]                     # (C, KK*C) bf16
        w2 = w2_ref[...]                     # (C, KK*C) bf16

        def conv(h, w_flat):
            # "same" zero-padded KxK conv as one MXU matmul over K*K masked
            # lane-rolls of the flattened map (all in VMEM).
            taps = []
            for t in range(KK):
                s = shifts[t]
                if t == center:
                    taps.append(h)           # s == 0, mask is all-ones
                else:
                    # shifted[n] = h[(n + s) mod HW]; wrap positions masked to 0
                    sh = pltpu.roll(h, (-s) % HW, 1)
                    taps.append(sh * masks[t:t + 1, :])
            patches = jnp.concatenate(taps, axis=0).astype(jnp.bfloat16)  # (KK*C, HW)
            return jnp.dot(w_flat, patches,
                           preferred_element_type=jnp.float32)            # (C, HW) f32

        # conv1 (BN1 scale in weights) -> +shift -> ReLU
        h = conv(x, w1) + t1_ref[...]
        h = jnp.maximum(h, 0.0)
        # conv2 (BN2 scale in weights) -> +shift
        h = conv(h, w2) + t2_ref[...]
        # residual add, lane-dense store
        o_ref[...] = h + x

    return kernel


# ----------------------------------------------------------------------------
# Wrapper: fold BN (+ conv bias) into weights/shifts, flatten weights, build
# the per-tap masks, launch the fused kernel.
# ----------------------------------------------------------------------------
def residual_block_forward(params, x, eps=1e-5):
    """x: (B, C, H, W) float32 -> (B, C, H, W) float32."""
    B, C, H, W = x.shape
    K = params["w1"].shape[-1]
    P = K // 2
    HW = H * W

    # Inference-mode BN fold:
    #   BN(conv(x) + b) = s * conv(x) + (s * (b - mean) + beta),
    #   s = gamma / sqrt(var + eps).  The per-output-channel scale s is folded
    #   directly into the conv weight rows; only the shift remains in-kernel.
    s1 = params["gamma1"] / jnp.sqrt(params["var1"] + eps)
    t1 = s1 * (params["b1"] - params["mean1"]) + params["beta1"]
    s2 = params["gamma2"] / jnp.sqrt(params["var2"] + eps)
    t2 = s2 * (params["b2"] - params["mean2"]) + params["beta2"]

    # Tap-major flattening: W_flat[co, t*C + ci] = s[co] * w[co, ci, ky, kx],
    # t = ky*K + kx.  Cast to bf16 for the MXU (accumulation is f32 in-kernel).
    def flat_w(w, s):
        return (w * s[:, None, None, None]).transpose(0, 2, 3, 1) \
                 .reshape(C, K * K * C).astype(jnp.bfloat16)

    w1f = flat_w(params["w1"], s1)
    w2f = flat_w(params["w2"], s2)

    # Per-tap lane shifts and zero-padding validity masks on the flattened map.
    ii = jnp.arange(HW, dtype=jnp.int32) // W
    jj = jnp.arange(HW, dtype=jnp.int32) % W
    shifts, masks = [], []
    for ky in range(K):
        for kx in range(K):
            oy, ox = ky - P, kx - P
            shifts.append(oy * W + ox)
            valid = ((ii + oy >= 0) & (ii + oy < H) &
                     (jj + ox >= 0) & (jj + ox < W))
            masks.append(valid.astype(jnp.float32))
    masks = jnp.stack(masks, axis=0)                      # (K*K, HW)

    x_flat = x.reshape(B, C, HW)
    kernel = _make_resblock_kernel(C, HW, K, tuple(shifts))

    out_flat = pl.pallas_call(
        kernel,
        out_shape=jax.ShapeDtypeStruct((B, C, HW), jnp.float32),
        grid=(B,),
        in_specs=[
            pl.BlockSpec((None, C, HW), lambda b: (b, 0, 0)),   # x (per-batch block)
            pl.BlockSpec((C, K * K * C), lambda b: (0, 0)),     # w1 (VMEM-resident)
            pl.BlockSpec((C, K * K * C), lambda b: (0, 0)),     # w2 (VMEM-resident)
            pl.BlockSpec((K * K, HW), lambda b: (0, 0)),        # masks (resident)
            pl.BlockSpec((C, 1), lambda b: (0, 0)),             # BN1 shift (+bias)
            pl.BlockSpec((C, 1), lambda b: (0, 0)),             # BN2 shift (+bias)
        ],
        out_specs=pl.BlockSpec((None, C, HW), lambda b: (b, 0, 0)),
        compiler_params=pltpu.CompilerParams(
            dimension_semantics=("parallel",)),                 # batch across TCs
    )(x_flat, w1f, w2f, masks, t1.reshape(C, 1), t2.reshape(C, 1))

    return out_flat.reshape(B, C, H, W)


# ----------------------------------------------------------------------------
# Pure-JAX float32 reference (PyTorch semantics, eval-mode BN) for validation.
# ----------------------------------------------------------------------------
def residual_block_ref(params, x, eps=1e-5):
    dn = ("NCHW", "OIHW", "NCHW")

    def conv(h, w, b):
        y = jax.lax.conv_general_dilated(h, w, (1, 1), "SAME", dimension_numbers=dn)
        return y + b[None, :, None, None]

    def bn(h, g, be, m, v):
        return (g[None, :, None, None] * (h - m[None, :, None, None])
                / jnp.sqrt(v[None, :, None, None] + eps) + be[None, :, None, None])

    h = conv(x, params["w1"], params["b1"])
    h = jnp.maximum(bn(h, params["gamma1"], params["beta1"],
                       params["mean1"], params["var1"]), 0.0)
    h = conv(h, params["w2"], params["b2"])
    h = bn(h, params["gamma2"], params["beta2"], params["mean2"], params["var2"])
    return h + x


if __name__ == "__main__":
    key = jax.random.PRNGKey(0)
    ks = jax.random.split(key, 13)

    B, C, H, W, K = 2, 16, 16, 16, 3
    x = jax.random.normal(ks[0], (B, C, H, W), jnp.float32)
    params = {
        "w1": 0.05 * jax.random.normal(ks[1], (C, C, K, K), jnp.float32),
        "b1": 0.1 * jax.random.normal(ks[2], (C,), jnp.float32),
        "gamma1": 1.0 + 0.1 * jax.random.normal(ks[3], (C,), jnp.float32),
        "beta1": 0.1 * jax.random.normal(ks[4], (C,), jnp.float32),
        "mean1": 0.1 * jax.random.normal(ks[5], (C,), jnp.float32),
        "var1": 1.0 + 0.2 * jax.random.uniform(ks[6], (C,), jnp.float32),
        "w2": 0.05 * jax.random.normal(ks[7], (C, C, K, K), jnp.float32),
        "b2": 0.1 * jax.random.normal(ks[8], (C,), jnp.float32),
        "gamma2": 1.0 + 0.1 * jax.random.normal(ks[9], (C,), jnp.float32),
        "beta2": 0.1 * jax.random.normal(ks[10], (C,), jnp.float32),
        "mean2": 0.1 * jax.random.normal(ks[11], (C,), jnp.float32),
        "var2": 1.0 + 0.2 * jax.random.uniform(ks[12], (C,), jnp.float32),
    }

    run = jax.jit(residual_block_forward)
    out = jax.block_until_ready(run(params, x))

    assert out.shape == (B, C, H, W), out.shape
    assert bool(jnp.all(jnp.isfinite(out)))

    ref = residual_block_ref(params, x)
    max_err = float(jnp.max(jnp.abs(out - ref)))
    assert max_err < 5e-2, f"max abs error vs f32 reference: {max_err}"

    print("KERNEL_OK")
</pallas_src>

<mosaic_0001>
module attributes {stable_mosaic.version = 11 : i64} {
  func.func @kernel(%arg0: i32, %arg1: memref<1x16x256xf32, #tpu.memory_space<vmem>>, %arg2: memref<16x144xbf16, #tpu.memory_space<vmem>>, %arg3: memref<16x144xbf16, #tpu.memory_space<vmem>>, %arg4: memref<9x256xf32, #tpu.memory_space<vmem>>, %arg5: memref<16x1xf32, #tpu.memory_space<vmem>>, %arg6: memref<16x1xf32, #tpu.memory_space<vmem>>, %arg7: memref<1x16x256xf32, #tpu.memory_space<vmem>>) attributes {dimension_semantics = [#tpu.dimension_semantics<parallel>], iteration_bounds = array<i64: 2>, scalar_prefetch = 0 : i64, scratch_operands = 0 : i64, tpu.core_type = #tpu.core_type<tc>, window_params = [{transform_indices = @transform_0, window_bounds = array<i64: 1, 16, 256>}, {pipeline_mode = #tpu.pipeline_mode<synchronous>, transform_indices = @transform_1, window_bounds = array<i64: 16, 144>}, {pipeline_mode = #tpu.pipeline_mode<synchronous>, transform_indices = @transform_2, window_bounds = array<i64: 16, 144>}, {pipeline_mode = #tpu.pipeline_mode<synchronous>, transform_indices = @transform_3, window_bounds = array<i64: 9, 256>}, {pipeline_mode = #tpu.pipeline_mode<synchronous>, transform_indices = @transform_4, window_bounds = array<i64: 16, 1>}, {pipeline_mode = #tpu.pipeline_mode<synchronous>, transform_indices = @transform_5, window_bounds = array<i64: 16, 1>}, {transform_indices = @transform_6, window_bounds = array<i64: 1, 16, 256>}]} {
    %c0 = arith.constant 0 : index
    %c0_0 = arith.constant 0 : index
    %c0_1 = arith.constant 0 : index
    %0 = vector.load %arg1[%c0, %c0_0, %c0_1] : memref<1x16x256xf32, #tpu.memory_space<vmem>>, vector<1x16x256xf32>
    %1 = vector.shape_cast %0 : vector<1x16x256xf32> to vector<16x256xf32>
    %c0_2 = arith.constant 0 : index
    %c0_3 = arith.constant 0 : index
    %2 = vector.load %arg4[%c0_2, %c0_3] : memref<9x256xf32, #tpu.memory_space<vmem>>, vector<9x256xf32>
    %c0_4 = arith.constant 0 : index
    %c0_5 = arith.constant 0 : index
    %3 = vector.load %arg2[%c0_4, %c0_5] : memref<16x144xbf16, #tpu.memory_space<vmem>>, vector<16x144xbf16>
    %c0_6 = arith.constant 0 : index
    %c0_7 = arith.constant 0 : index
    %4 = vector.load %arg3[%c0_6, %c0_7] : memref<16x144xbf16, #tpu.memory_space<vmem>>, vector<16x144xbf16>
    %c17_i32 = arith.constant 17 : i32
    %5 = tpu.dynamic_rotate %1 by %c17_i32 dim 1 : vector<16x256xf32>, i32 -> vector<16x256xf32>
    %6 = vector.extract_strided_slice %2 {offsets = [0, 0], sizes = [1, 256], strides = [1, 1]} : vector<9x256xf32> to vector<1x256xf32>
    %7 = vector.broadcast %6 : vector<1x256xf32> to vector<16x256xf32>
    %8 = arith.mulf %5, %7 : vector<16x256xf32>
    %c16_i32 = arith.constant 16 : i32
    %9 = tpu.dynamic_rotate %1 by %c16_i32 dim 1 : vector<16x256xf32>, i32 -> vector<16x256xf32>
    %10 = vector.extract_strided_slice %2 {offsets = [1, 0], sizes = [1, 256], strides = [1, 1]} : vector<9x256xf32> to vector<1x256xf32>
    %11 = vector.broadcast %10 : vector<1x256xf32> to vector<16x256xf32>
    %12 = arith.mulf %9, %11 : vector<16x256xf32>
    %c15_i32 = arith.constant 15 : i32
    %13 = tpu.dynamic_rotate %1 by %c15_i32 dim 1 : vector<16x256xf32>, i32 -> vector<16x256xf32>
    %14 = vector.extract_strided_slice %2 {offsets = [2, 0], sizes = [1, 256], strides = [1, 1]} : vector<9x256xf32> to vector<1x256xf32>
    %15 = vector.broadcast %14 : vector<1x256xf32> to vector<16x256xf32>
    %16 = arith.mulf %13, %15 : vector<16x256xf32>
    %c1_i32 = arith.constant 1 : i32
    %17 = tpu.dynamic_rotate %1 by %c1_i32 dim 1 : vector<16x256xf32>, i32 -> vector<16x256xf32>
    %18 = vector.extract_strided_slice %2 {offsets = [3, 0], sizes = [1, 256], strides = [1, 1]} : vector<9x256xf32> to vector<1x256xf32>
    %19 = vector.broadcast %18 : vector<1x256xf32> to vector<16x256xf32>
    %20 = arith.mulf %17, %19 : vector<16x256xf32>
    %c255_i32 = arith.constant 255 : i32
    %21 = tpu.dynamic_rotate %1 by %c255_i32 dim 1 : vector<16x256xf32>, i32 -> vector<16x256xf32>
    %22 = vector.extract_strided_slice %2 {offsets = [5, 0], sizes = [1, 256], strides = [1, 1]} : vector<9x256xf32> to vector<1x256xf32>
    %23 = vector.broadcast %22 : vector<1x256xf32> to vector<16x256xf32>
    %24 = arith.mulf %21, %23 : vector<16x256xf32>
    %c241_i32 = arith.constant 241 : i32
    %25 = tpu.dynamic_rotate %1 by %c241_i32 dim 1 : vector<16x256xf32>, i32 -> vector<16x256xf32>
    %26 = vector.extract_strided_slice %2 {offsets = [6, 0], sizes = [1, 256], strides = [1, 1]} : vector<9x256xf32> to vector<1x256xf32>
    %27 = vector.broadcast %26 : vector<1x256xf32> to vector<16x256xf32>
    %28 = arith.mulf %25, %27 : vector<16x256xf32>
    %c240_i32 = arith.constant 240 : i32
    %29 = tpu.dynamic_rotate %1 by %c240_i32 dim 1 : vector<16x256xf32>, i32 -> vector<16x256xf32>
    %30 = vector.extract_strided_slice %2 {offsets = [7, 0], sizes = [1, 256], strides = [1, 1]} : vector<9x256xf32> to vector<1x256xf32>
    %31 = vector.broadcast %30 : vector<1x256xf32> to vector<16x256xf32>
    %32 = arith.mulf %29, %31 : vector<16x256xf32>
    %c239_i32 = arith.constant 239 : i32
    %33 = tpu.dynamic_rotate %1 by %c239_i32 dim 1 : vector<16x256xf32>, i32 -> vector<16x256xf32>
    %34 = vector.extract_strided_slice %2 {offsets = [8, 0], sizes = [1, 256], strides = [1, 1]} : vector<9x256xf32> to vector<1x256xf32>
    %35 = vector.broadcast %34 : vector<1x256xf32> to vector<16x256xf32>
    %36 = arith.mulf %33, %35 : vector<16x256xf32>
    %37 = tpu.concatenate %8, %12, %16, %20, %1, %24, %28, %32, %36 in 0 : vector<16x256xf32>, vector<16x256xf32>, vector<16x256xf32>, vector<16x256xf32>, vector<16x256xf32>, vector<16x256xf32>, vector<16x256xf32>, vector<16x256xf32>, vector<16x256xf32> -> vector<144x256xf32>
    %38 = arith.truncf %37 : vector<144x256xf32> to vector<144x256xbf16>
    %cst = arith.constant dense<0.000000e+00> : vector<16x256xf32>
    %39 = tpu.matmul %3, %38, %cst {dimension_numbers = #tpu.dot_dimension_numbers<[1], [0], [0], [1], [0, 0, 1, 1], [], []>} : vector<16x144xbf16>, vector<144x256xbf16>, vector<16x256xf32> -> vector<16x256xf32>
    %c0_8 = arith.constant 0 : index
    %c0_9 = arith.constant 0 : index
    %40 = vector.load %arg5[%c0_8, %c0_9] : memref<16x1xf32, #tpu.memory_space<vmem>>, vector<16x1xf32>
    %41 = vector.broadcast %40 : vector<16x1xf32> to vector<16x256xf32>
    %42 = arith.addf %39, %41 : vector<16x256xf32>
    %cst_10 = arith.constant 0.000000e+00 : f32
    %43 = vector.broadcast %cst_10 : f32 to vector<16x256xf32>
    %44 = arith.maximumf %42, %43 : vector<16x256xf32>
    %c17_i32_11 = arith.constant 17 : i32
    %45 = tpu.dynamic_rotate %44 by %c17_i32_11 dim 1 : vector<16x256xf32>, i32 -> vector<16x256xf32>
    %46 = vector.extract_strided_slice %2 {offsets = [0, 0], sizes = [1, 256], strides = [1, 1]} : vector<9x256xf32> to vector<1x256xf32>
    %47 = vector.broadcast %46 : vector<1x256xf32> to vector<16x256xf32>
    %48 = arith.mulf %45, %47 : vector<16x256xf32>
    %c16_i32_12 = arith.constant 16 : i32
    %49 = tpu.dynamic_rotate %44 by %c16_i32_12 dim 1 : vector<16x256xf32>, i32 -> vector<16x256xf32>
    %50 = vector.extract_strided_slice %2 {offsets = [1, 0], sizes = [1, 256], strides = [1, 1]} : vector<9x256xf32> to vector<1x256xf32>
    %51 = vector.broadcast %50 : vector<1x256xf32> to vector<16x256xf32>
    %52 = arith.mulf %49, %51 : vector<16x256xf32>
    %c15_i32_13 = arith.constant 15 : i32
    %53 = tpu.dynamic_rotate %44 by %c15_i32_13 dim 1 : vector<16x256xf32>, i32 -> vector<16x256xf32>
    %54 = vector.extract_strided_slice %2 {offsets = [2, 0], sizes = [1, 256], strides = [1, 1]} : vector<9x256xf32> to vector<1x256xf32>
    %55 = vector.broadcast %54 : vector<1x256xf32> to vector<16x256xf32>
    %56 = arith.mulf %53, %55 : vector<16x256xf32>
    %c1_i32_14 = arith.constant 1 : i32
    %57 = tpu.dynamic_rotate %44 by %c1_i32_14 dim 1 : vector<16x256xf32>, i32 -> vector<16x256xf32>
    %58 = vector.extract_strided_slice %2 {offsets = [3, 0], sizes = [1, 256], strides = [1, 1]} : vector<9x256xf32> to vector<1x256xf32>
    %59 = vector.broadcast %58 : vector<1x256xf32> to vector<16x256xf32>
    %60 = arith.mulf %57, %59 : vector<16x256xf32>
    %c255_i32_15 = arith.constant 255 : i32
    %61 = tpu.dynamic_rotate %44 by %c255_i32_15 dim 1 : vector<16x256xf32>, i32 -> vector<16x256xf32>
    %62 = vector.extract_strided_slice %2 {offsets = [5, 0], sizes = [1, 256], strides = [1, 1]} : vector<9x256xf32> to vector<1x256xf32>
    %63 = vector.broadcast %62 : vector<1x256xf32> to vector<16x256xf32>
    %64 = arith.mulf %61, %63 : vector<16x256xf32>
    %c241_i32_16 = arith.constant 241 : i32
    %65 = tpu.dynamic_rotate %44 by %c241_i32_16 dim 1 : vector<16x256xf32>, i32 -> vector<16x256xf32>
    %66 = vector.extract_strided_slice %2 {offsets = [6, 0], sizes = [1, 256], strides = [1, 1]} : vector<9x256xf32> to vector<1x256xf32>
    %67 = vector.broadcast %66 : vector<1x256xf32> to vector<16x256xf32>
    %68 = arith.mulf %65, %67 : vector<16x256xf32>
    %c240_i32_17 = arith.constant 240 : i32
    %69 = tpu.dynamic_rotate %44 by %c240_i32_17 dim 1 : vector<16x256xf32>, i32 -> vector<16x256xf32>
    %70 = vector.extract_strided_slice %2 {offsets = [7, 0], sizes = [1, 256], strides = [1, 1]} : vector<9x256xf32> to vector<1x256xf32>
    %71 = vector.broadcast %70 : vector<1x256xf32> to vector<16x256xf32>
    %72 = arith.mulf %69, %71 : vector<16x256xf32>
    %c239_i32_18 = arith.constant 239 : i32
    %73 = tpu.dynamic_rotate %44 by %c239_i32_18 dim 1 : vector<16x256xf32>, i32 -> vector<16x256xf32>
    %74 = vector.extract_strided_slice %2 {offsets = [8, 0], sizes = [1, 256], strides = [1, 1]} : vector<9x256xf32> to vector<1x256xf32>
    %75 = vector.broadcast %74 : vector<1x256xf32> to vector<16x256xf32>
    %76 = arith.mulf %73, %75 : vector<16x256xf32>
    %77 = tpu.concatenate %48, %52, %56, %60, %44, %64, %68, %72, %76 in 0 : vector<16x256xf32>, vector<16x256xf32>, vector<16x256xf32>, vector<16x256xf32>, vector<16x256xf32>, vector<16x256xf32>, vector<16x256xf32>, vector<16x256xf32>, vector<16x256xf32> -> vector<144x256xf32>
    %78 = arith.truncf %77 : vector<144x256xf32> to vector<144x256xbf16>
    %cst_19 = arith.constant dense<0.000000e+00> : vector<16x256xf32>
    %79 = tpu.matmul %4, %78, %cst_19 {dimension_numbers = #tpu.dot_dimension_numbers<[1], [0], [0], [1], [0, 0, 1, 1], [], []>} : vector<16x144xbf16>, vector<144x256xbf16>, vector<16x256xf32> -> vector<16x256xf32>
    %c0_20 = arith.constant 0 : index
    %c0_21 = arith.constant 0 : index
    %80 = vector.load %arg6[%c0_20, %c0_21] : memref<16x1xf32, #tpu.memory_space<vmem>>, vector<16x1xf32>
    %81 = vector.broadcast %80 : vector<16x1xf32> to vector<16x256xf32>
    %82 = arith.addf %79, %81 : vector<16x256xf32>
    %83 = arith.addf %82, %1 : vector<16x256xf32>
    %c0_22 = arith.constant 0 : index
    %c0_23 = arith.constant 0 : index
    %c0_24 = arith.constant 0 : index
    %84 = vector.load %arg7[%c0_22, %c0_23, %c0_24] : memref<1x16x256xf32, #tpu.memory_space<vmem>>, vector<1x16x256xf32>
    %85 = vector.shape_cast %84 : vector<1x16x256xf32> to vector<16x256xf32>
    %86 = vector.shape_cast %83 : vector<16x256xf32> to vector<1x16x256xf32>
    tpu.vector_store %arg7[%c0_22, %c0_23, %c0_24], %86 {strides = array<i32>} : memref<1x16x256xf32, #tpu.memory_space<vmem>>, vector<1x16x256xf32>,
    return
  }
  func.func @transform_0(%arg0: i32) -> (i32, i32, i32) {
    %c0_i32 = arith.constant 0 : i32
    %c0_i32_0 = arith.constant 0 : i32
    %c0_i32_1 = arith.constant 0 : i32
    return %arg0, %c0_i32, %c0_i32_0 : i32, i32, i32
  }
  func.func @transform_1(%arg0: i32) -> (i32, i32) {
    %c0_i32 = arith.constant 0 : i32
    %c0_i32_0 = arith.constant 0 : i32
    %c0_i32_1 = arith.constant 0 : i32
    return %c0_i32, %c0_i32_0 : i32, i32
  }
  func.func @transform_2(%arg0: i32) -> (i32, i32) {
    %c0_i32 = arith.constant 0 : i32
    %c0_i32_0 = arith.constant 0 : i32
    %c0_i32_1 = arith.constant 0 : i32
    return %c0_i32, %c0_i32_0 : i32, i32
  }
  func.func @transform_3(%arg0: i32) -> (i32, i32) {
    %c0_i32 = arith.constant 0 : i32
    %c0_i32_0 = arith.constant 0 : i32
    %c0_i32_1 = arith.constant 0 : i32
    return %c0_i32, %c0_i32_0 : i32, i32
  }
  func.func @transform_4(%arg0: i32) -> (i32, i32) {
    %c0_i32 = arith.constant 0 : i32
    %c0_i32_0 = arith.constant 0 : i32
    %c0_i32_1 = arith.constant 0 : i32
    return %c0_i32, %c0_i32_0 : i32, i32
  }
  func.func @transform_5(%arg0: i32) -> (i32, i32) {
    %c0_i32 = arith.constant 0 : i32
    %c0_i32_0 = arith.constant 0 : i32
    %c0_i32_1 = arith.constant 0 : i32
    return %c0_i32, %c0_i32_0 : i32, i32
  }
  func.func @transform_6(%arg0: i32) -> (i32, i32, i32) {
    %c0_i32 = arith.constant 0 : i32
    %c0_i32_0 = arith.constant 0 : i32
    %c0_i32_1 = arith.constant 0 : i32
    return %arg0, %c0_i32, %c0_i32_0 : i32, i32, i32
  }
}

</mosaic_0001>

<bundles_post_ra>
// kernel: residual_block_forward.1
= control target key start
LH: loop header
LB: loop body
LE: loop exit
PB: predicated region body
PF: predicated region fallthrough
CT: control target
= control target key end

     0   :  { %s931_s21 = smov 0   ;;  %s1440_s0 = inlined_call_operand.vmem [shape: f32[2,16,256], index: 0, kind: input, shape index: {}]   ;;  %s1441_s1 = inlined_call_operand.vmem [shape: bf16[16,144], index: 1, kind: input, shape index: {}]   ;;  %s1442_s2 = inlined_call_operand.vmem [shape: bf16[16,144], index: 2, kind: input, shape index: {}]   ;;  %s1443_s3 = inlined_call_operand.vmem [shape: f32[9,256], index: 3, kind: input, shape index: {}]   ;;  %s1444_s4 = inlined_call_operand.vmem [shape: f32[16,1], index: 4, kind: input, shape index: {}]   ;;  %s1445_s5 = inlined_call_operand.vmem [shape: f32[16,1], index: 5, kind: input, shape index: {}]   ;;  %s1446_s6 = inlined_call_operand.vmem [shape: f32[2,16,256], index: 6, kind: output, shape index: {}]  }
   0x1 LB: > { %s833_s22 = sadd.s32 4294967295, %s885_s21   ;;  %p837_p0 = scmp.ge.s32.totalorder %s885_s21, 1  ;;  %s885_s21 = sphi %s931_s21, %s16_s21  }
   0x2   : > { %p212_p1 = scmp.lt.s32.totalorder %s885_s21, 3 }
   0x4   : > { %p213_p2 = pnand %p837_p0, %p212_p1 }
   0x5   : > { %p242_p3 = scmp.lt.s32.totalorder (!%p213_p2), %s833_s22, 1  ;;  %s887_s27 = smov (!%p213_p2), 17   ;;  %v875_v4 = vld [vmem:[%s1441_s1 + $0x4] ss:$8 sps:$4 sm:$0xff] (!%p213_p2)   ;;  %vm506_vm0 = vcmask (!%p213_p2), 130048   ;;  %v895_v5 = vmov (!%p213_p2), 0   ;;  %v273_v8 = vlaneseq (!%p213_p2) }
   0x6   : > { %216 = sbr.rel (%p213_p2) target bundleno = 823 (0x337), region = 44  ;;  %s888_s28 = smov (!%p213_p2), 16   ;;  %846 = vmatprep.mubr.msk.bf16.mxu0 (!%p213_p2), %vm506_vm0, %v875_v4  ;;  %871 = vset.pattern.permute.xlu0 (!%p213_p2), %v895_v5  ;;  %v485_v6 = vld [vmem:[%s1444_s4] sm:$0xff] (!%p213_p2)  ;;  %v486_v7 = vld [vmem:[%s1444_s4 + $0x8] sm:$0xff] (!%p213_p2) }
   0x7   : > { %s889_s29 = smov (!%p213_p2), 15   ;;  %s890_s30 = smov (!%p213_p2), 1   ;;  %872 = vset.pattern.permute.xlu1 (!%p213_p2), %v895_v5  ;;  %v1029_v9 = vshrl.u32 (!%p213_p2), %v273_v8, 7  ;;  %v1031_v10 = vand.u32 (!%p213_p2), 127, %v273_v8  ;;  %v1037_v12 = vld [vmem:[%s1443_s3] sm:$0xff] (!%p213_p2)  ;;  %v1042_v13 = vld [vmem:[%s1443_s3 + $0x8] sm:$0xff] (!%p213_p2) }
   0x8   : > { %s891_s7 = smov (!%p213_p2), 127   ;;  %s892_s8 = smov (!%p213_p2), 113  }
   0x9   : > { %s893_s9 = smov (!%p213_p2), 112   ;;  %s894_s12 = smov (!%p213_p2), 111   ;;  %v282_v11 = vsub.s32 (!%p213_p2), 0, %v1029_v9  ;;  %vm275_vm1 = vcmp.lt.s32.totalorder (!%p213_p2), %v1031_v10, 17  ;;  %v307_v24 = vsub.s32 (!%p213_p2), 1, %v1029_v9  ;;  %vm300_vm2 = vcmp.lt.s32.totalorder (!%p213_p2), %v1031_v10, 16 }
   0xa   : > { %v332_v37 = vsub.s32 (!%p213_p2), 2, %v1029_v9  ;;  %vm325_vm3 = vcmp.lt.s32.totalorder (!%p213_p2), %v1031_v10, 15  ;;  %v357_v54 = vsub.s32 (!%p213_p2), 3, %v1029_v9  ;;  %vm350_vm4 = vcmp.lt.s32.totalorder (!%p213_p2), %v1031_v10, 1 }
   0xb   : > { %v1046_v16 = vrot.slane (!%p213_p2), %v1037_v12, %v282_v11  ;;  %v1049_v17 = vrot.slane (!%p213_p2), %v1042_v13, %v282_v11  ;;  %v1066_v33 = vrot.slane (!%p213_p2), %v1037_v12, %v307_v24  ;;  %v1069_v34 = vrot.slane (!%p213_p2), %v1042_v13, %v307_v24 }
   0xc   : > { %v1086_v50 = vrot.slane (!%p213_p2), %v1037_v12, %v332_v37  ;;  %v1089_v51 = vrot.slane (!%p213_p2), %v1042_v13, %v332_v37  ;;  %v1109_v8 = vrot.slane (!%p213_p2), %v1042_v13, %v357_v54  ;;  %vm375_vm5 = vcmp.lt.s32.totalorder (!%p213_p2), %v1031_v10, 127 }
   0xd   : > { %s1448_s22 = smov (!%p242_p3, %s833_s22), 1  ;;  %vm400_vm6 = vcmp.lt.s32.totalorder %v1031_v10, 113  ;;  %vm425_vm7 = vcmp.lt.s32.totalorder %v1031_v10, 112  ;;  %vm450_vm8 = vcmp.lt.s32.totalorder %v1031_v10, 111 }
   0xe   : > { %s852_s23 = sshll.u32 %s1448_s22, 5 }
   0xf   : > { %s246_s26 = scalar_lea.vmem %s1440_s0, %s852_s23  ;;  %s251_s16 = scalar_lea.vmem %s1446_s6, %s852_s23 }
  0x10   : > { %v947_v0 = vld [vmem:[%s246_s26 + $0x8] sm:$0xff]  ;;  %v949_v1 = vld [vmem:[%s246_s26] sm:$0xff]  ;;  %v955_v2 = vld [vmem:[%s246_s26 + $0x18] sm:$0xff] }
  0x11   : > { %269 = vrot.lane.b32.xlu1 %v947_v0, %s887_s27  ;;  %265 = vrot.lane.b32.xlu0 %v949_v1, %s887_s27  ;;  %v957_v3 = vld [vmem:[%s246_s26 + $0x10] sm:$0xff] }
  0x15   : > { %271 = vrot.lane.b32.xlu1 %v955_v2, %s887_s27  ;;  %267 = vrot.lane.b32.xlu0 %v957_v3, %s887_s27 }
  0x19   : > { %294 = vrot.lane.b32.xlu1 %v957_v3, %s888_s28  ;;  %292 = vrot.lane.b32.xlu0 %v949_v1, %s888_s28 }
  0x1d   : > { %298 = vrot.lane.b32.xlu1 %v955_v2, %s888_s28  ;;  %296 = vrot.lane.b32.xlu0 %v947_v0, %s888_s28 }
  0x21   : > { %319 = vrot.lane.b32.xlu1 %v957_v3, %s889_s29  ;;  %317 = vrot.lane.b32.xlu0 %v949_v1, %s889_s29 }
  0x25   : > { %323 = vrot.lane.b32.xlu1 %v955_v2, %s889_s29  ;;  %321 = vrot.lane.b32.xlu0 %v947_v0, %s889_s29 }
  0x29   : > { %344 = vrot.lane.b32.xlu1 %v957_v3, %s890_s30  ;;  %342 = vrot.lane.b32.xlu0 %v949_v1, %s890_s30 }
  0x2d   : > { %348 = vrot.lane.b32.xlu1 %v955_v2, %s890_s30  ;;  %346 = vrot.lane.b32.xlu0 %v947_v0, %s890_s30 }
  0x31   : > { %369 = vrot.lane.b32.xlu1 %v957_v3, %s891_s7  ;;  %367 = vrot.lane.b32.xlu0 %v949_v1, %s891_s7 }
  0x35   : > { %373 = vrot.lane.b32.xlu1 %v955_v2, %s891_s7  ;;  %371 = vrot.lane.b32.xlu0 %v947_v0, %s891_s7 }
  0x39   : > { %394 = vrot.lane.b32.xlu1 %v957_v3, %s892_s8  ;;  %392 = vrot.lane.b32.xlu0 %v949_v1, %s892_s8 }
  0x3d   : > { %398 = vrot.lane.b32.xlu1 %v955_v2, %s892_s8  ;;  %396 = vrot.lane.b32.xlu0 %v947_v0, %s892_s8 }
  0x41   : > { %419 = vrot.lane.b32.xlu1 %v957_v3, %s893_s9  ;;  %417 = vrot.lane.b32.xlu0 %v949_v1, %s893_s9 }
  0x45   : > { %423 = vrot.lane.b32.xlu1 %v955_v2, %s893_s9  ;;  %421 = vrot.lane.b32.xlu0 %v947_v0, %s893_s9 }
  0x49   : > { %444 = vrot.lane.b32.xlu1 %v957_v3, %s894_s12  ;;  %442 = vrot.lane.b32.xlu0 %v949_v1, %s894_s12 }
  0x4d   : > { %448 = vrot.lane.b32.xlu1 %v955_v2, %s894_s12  ;;  %446 = vrot.lane.b32.xlu0 %v947_v0, %s894_s12 }
  0x51   : > { %489 = vperm.xlu0 %871, %v485_v6   ;;  %494 = vperm.xlu1 %872, %v486_v7   ;;  %v1106_v7 = vrot.slane %v1037_v12, %v357_v54 }
  0x83   : > { %v270_v14 = vpop.permute.xlu1 %269  ;;  %v266_v15 = vpop.permute.xlu0 %265 }
  0x84   : > { %v276_v18 = vsel %vm275_vm1, %v266_v15, %v270_v14  ;;  %v278_v19 = vsel %vm275_vm1, %v270_v14, %v266_v15  ;;  %v382_v15 = vsub.s32 5, %v1029_v9 }
  0x85   : > { %v288_v25 = vmul.f32 %v1046_v16, %v278_v19  ;;  %v289_v27 = vmul.f32 %v1049_v17, %v276_v18 }
  0x87   : > { %v272_v20 = vpop.permute.xlu1 %271  ;;  %v268_v21 = vpop.permute.xlu0 %267 }
  0x88   : > { %v277_v22 = vsel %vm275_vm1, %v268_v21, %v272_v20  ;;  %v279_v23 = vsel %vm275_vm1, %v272_v20, %v268_v21 }
  0x89   : > { %v290_v26 = vmul.f32 %v1046_v16, %v279_v23  ;;  %v291_v28 = vmul.f32 %v1049_v17, %v277_v22 }
  0x8b   : > { %v295_v29 = vpop.permute.xlu1 %294  ;;  %v293_v30 = vpop.permute.xlu0 %292  ;;  %v468_v31 = vpack.c.bf16 %v291_v28, %v289_v27  ;;  %v467_v32 = vpack.c.bf16 %v290_v26, %v288_v25 }
  0x8d   : > { %510 = vmatprep.subr.bf16.mxu0 %v468_v31  ;;  %v1128_v31 = vrot.slane %v1037_v12, %v382_v15 }
  0x8e   : > { %511 = vmatpush1.bf16.msra.mxu0 %v467_v32  ;;  %v1131_v32 = vrot.slane %v1042_v13, %v382_v15 }
  0x8f   : > { %v299_v35 = vpop.permute.xlu1 %298  ;;  %v297_v36 = vpop.permute.xlu0 %296 }
  0x90   : > { %v302_v38 = vsel %vm300_vm2, %v295_v29, %v299_v35  ;;  %v304_v39 = vsel %vm300_vm2, %v299_v35, %v295_v29  ;;  %v301_v40 = vsel %vm300_vm2, %v293_v30, %v297_v36  ;;  %v303_v41 = vsel %vm300_vm2, %v297_v36, %v293_v30 }
  0x91   : > { %v315_v42 = vmul.f32 %v1066_v33, %v304_v39  ;;  %v316_v43 = vmul.f32 %v1069_v34, %v302_v38  ;;  %v313_v44 = vmul.f32 %v1066_v33, %v303_v41  ;;  %v314_v45 = vmul.f32 %v1069_v34, %v301_v40 }
  0x92   : > { %v476_v30 = vpack.c.bf16 %v955_v2, %v947_v0  ;;  %v475_v35 = vpack.c.bf16 %v957_v3, %v949_v1  ;;  %v407_v38 = vsub.s32 6, %v1029_v9 }
  0x93   : > { %v320_v46 = vpop.permute.xlu1 %319  ;;  %v318_v47 = vpop.permute.xlu0 %317  ;;  %v470_v48 = vpack.c.bf16 %v316_v43, %v314_v45  ;;  %v469_v49 = vpack.c.bf16 %v315_v42, %v313_v44 }
  0x94   : > { %v1153_v54 = vrot.slane %v1042_v13, %v407_v38 }
  0x95   : > { %512 = vmatprep.subr.bf16.mxu0 %v470_v48 }
  0x96   : > { %513 = vmatpush1.bf16.msra.mxu0 %v469_v49 }
  0x97   : > { %v324_v52 = vpop.permute.xlu1 %323  ;;  %v322_v53 = vpop.permute.xlu0 %321 }
  0x98   : > { %v327_v55 = vsel %vm325_vm3, %v320_v46, %v324_v52  ;;  %v329_v56 = vsel %vm325_vm3, %v324_v52, %v320_v46  ;;  %v326_v57 = vsel %vm325_vm3, %v318_v47, %v322_v53  ;;  %v328_v58 = vsel %vm325_vm3, %v322_v53, %v318_v47 }
  0x99   : > { %v340_v59 = vmul.f32 %v1086_v50, %v329_v56  ;;  %v341_v60 = vmul.f32 %v1089_v51, %v327_v55  ;;  %v338_v61 = vmul.f32 %v1086_v50, %v328_v58  ;;  %v339_v62 = vmul.f32 %v1089_v51, %v326_v57 }
  0x9a   : > { %v1150_v53 = vrot.slane %v1037_v12, %v407_v38  ;;  %v432_v57 = vsub.s32 7, %v1029_v9 }
  0x9b   : > { %v345_v63 = vpop.permute.xlu1 %344  ;;  %v343_v4 = vpop.permute.xlu0 %342  ;;  %v472_v5 = vpack.c.bf16 %v341_v60, %v339_v62  ;;  %v471_v6 = vpack.c.bf16 %v340_v59, %v338_v61 }
  0x9c   : > { %v1170_v15 = vrot.slane %v1037_v12, %v432_v57 }
  0x9d   : > { %514 = vmatprep.subr.bf16.mxu0 %v472_v5 }
  0x9e   : > { %515 = vmatpush1.bf16.msra.mxu0 %v471_v6 }
  0x9f   : > { %v349_v11 = vpop.permute.xlu1 %348  ;;  %v347_v14 = vpop.permute.xlu0 %346 }
  0xa0   : > { %v352_v18 = vsel %vm350_vm4, %v345_v63, %v349_v11  ;;  %v354_v19 = vsel %vm350_vm4, %v349_v11, %v345_v63  ;;  %v351_v20 = vsel %vm350_vm4, %v343_v4, %v347_v14  ;;  %v353_v21 = vsel %vm350_vm4, %v347_v14, %v343_v4 }
  0xa1   : > { %v365_v22 = vmul.f32 %v1106_v7, %v354_v19  ;;  %v366_v23 = vmul.f32 %v1109_v8, %v352_v18  ;;  %v363_v24 = vmul.f32 %v1106_v7, %v353_v21  ;;  %v364_v25 = vmul.f32 %v1109_v8, %v351_v20 }
  0xa2   : > { %v1173_v18 = vrot.slane %v1042_v13, %v432_v57 }
  0xa3   : > { %v370_v26 = vpop.permute.xlu1 %369  ;;  %v368_v27 = vpop.permute.xlu0 %367  ;;  %v474_v28 = vpack.c.bf16 %v366_v23, %v364_v25  ;;  %v473_v29 = vpack.c.bf16 %v365_v22, %v363_v24 }
  0xa5   : > { %516 = vmatprep.subr.bf16.mxu0 %v474_v28 }
  0xa6   : > { %517 = vmatpush1.bf16.msra.mxu0 %v473_v29 }
  0xa7   : > { %v374_v36 = vpop.permute.xlu1 %373  ;;  %v372_v37 = vpop.permute.xlu0 %371  ;;  %518 = vmatprep.subr.bf16.mxu0 %v476_v30 }
  0xa8   : > { %v377_v39 = vsel %vm375_vm5, %v370_v26, %v374_v36  ;;  %v379_v40 = vsel %vm375_vm5, %v374_v36, %v370_v26  ;;  %v376_v41 = vsel %vm375_vm5, %v368_v27, %v372_v37  ;;  %v378_v42 = vsel %vm375_vm5, %v372_v37, %v368_v27  ;;  %v1196_v36 = vld [vmem:[%s1443_s3 + $0x18] ss:$0 sm:$0xff] }
  0xa9   : > { %v390_v43 = vmul.f32 %v1128_v31, %v377_v39  ;;  %v391_v44 = vmul.f32 %v1131_v32, %v379_v40  ;;  %v388_v45 = vmul.f32 %v1128_v31, %v376_v41  ;;  %v389_v46 = vmul.f32 %v1131_v32, %v378_v42 }
  0xaa   : > { %519 = vmatpush1.bf16.msra.mxu0 %v475_v35  ;;  %v1191_v35 = vld [vmem:[%s1443_s3 + $0x10] ss:$0 sm:$0xff] }
  0xab   : > { %v395_v47 = vpop.permute.xlu1 %394  ;;  %v393_v48 = vpop.permute.xlu0 %392  ;;  %v478_v49 = vpack.c.bf16 %v391_v44, %v389_v46  ;;  %v477_v52 = vpack.c.bf16 %v390_v43, %v388_v45 }
  0xad   : > { %520 = vmatprep.subr.bf16.mxu0 %v478_v49  ;;  %v873_v49 = vld [vmem:[%s1441_s1] ss:$8 sps:$4 sm:$0xff]  }
  0xae   : > { %521 = vmatpush1.bf16.msra.mxu0 %v477_v52 }
  0xaf   : > { %v399_v55 = vpop.permute.xlu1 %398  ;;  %v397_v56 = vpop.permute.xlu0 %396 }
  0xb0   : > { %v402_v58 = vsel %vm400_vm6, %v395_v47, %v399_v55  ;;  %v404_v59 = vsel %vm400_vm6, %v399_v55, %v395_v47  ;;  %v401_v60 = vsel %vm400_vm6, %v393_v48, %v397_v56  ;;  %v403_v61 = vsel %vm400_vm6, %v397_v56, %v393_v48 }
  0xb1   : > { %v415_v62 = vmul.f32 %v1150_v53, %v402_v58  ;;  %v416_v63 = vmul.f32 %v1153_v54, %v404_v59  ;;  %v413_v4 = vmul.f32 %v1150_v53, %v401_v60  ;;  %v414_v9 = vmul.f32 %v1153_v54, %v403_v61 }
  0xb3   : > { %v420_v5 = vpop.permute.xlu1 %419  ;;  %v418_v6 = vpop.permute.xlu0 %417  ;;  %v480_v11 = vpack.c.bf16 %v416_v63, %v414_v9  ;;  %v479_v14 = vpack.c.bf16 %v415_v62, %v413_v4 }
  0xb5   : > { %522 = vmatprep.subr.bf16.mxu0 %v480_v11 }
  0xb6   : > { %523 = vmatpush1.bf16.msra.mxu0 %v479_v14 }
  0xb7   : > { %v424_v19 = vpop.permute.xlu1 %423  ;;  %v422_v20 = vpop.permute.xlu0 %421 }
  0xb8   : > { %v427_v21 = vsel %vm425_vm7, %v420_v5, %v424_v19  ;;  %v429_v22 = vsel %vm425_vm7, %v424_v19, %v420_v5  ;;  %v426_v23 = vsel %vm425_vm7, %v418_v6, %v422_v20  ;;  %v428_v24 = vsel %vm425_vm7, %v422_v20, %v418_v6  ;;  %v878_v19 = vld [vmem:[%s1442_s2 + $0x4] ss:$8 sps:$4 sm:$0xff]  }
  0xb9   : > { %v440_v12 = vmul.f32 %v1170_v15, %v427_v21  ;;  %v441_v13 = vmul.f32 %v1173_v18, %v429_v22  ;;  %v438_v25 = vmul.f32 %v1170_v15, %v426_v23  ;;  %v439_v26 = vmul.f32 %v1173_v18, %v428_v24  ;;  %849 = vmatprep.mubr.msk.bf16.mxu1 %vm506_vm0, %v878_v19  ;;  %v703_v20 = vld [vmem:[%s1445_s5] sm:$0xff]  ;;  %v704_v21 = vld [vmem:[%s1445_s5 + $0x8] sm:$0xff] }
  0xbb   : > { %v445_v27 = vpop.permute.xlu1 %444  ;;  %v443_v28 = vpop.permute.xlu0 %442  ;;  %v482_v29 = vpack.c.bf16 %v441_v13, %v439_v26  ;;  %v481_v30 = vpack.c.bf16 %v440_v12, %v438_v25 }
  0xbd   : > { %524 = vmatprep.subr.bf16.mxu0 %v482_v29 }
  0xbe   : > { %525 = vmatpush1.bf16.msra.mxu0 %v481_v30 }
  0xbf   : > { %v449_v37 = vpop.permute.xlu1 %448  ;;  %v447_v38 = vpop.permute.xlu0 %446 }
  0xc0   : > { %v452_v39 = vsel %vm450_vm8, %v445_v27, %v449_v37  ;;  %v454_v40 = vsel %vm450_vm8, %v449_v37, %v445_v27  ;;  %v451_v41 = vsel %vm450_vm8, %v443_v28, %v447_v38  ;;  %v453_v42 = vsel %vm450_vm8, %v447_v38, %v443_v28 }
  0xc1   : > { %v465_v43 = vmul.f32 %v1191_v35, %v452_v39  ;;  %v466_v44 = vmul.f32 %v1196_v36, %v454_v40  ;;  %v463_v45 = vmul.f32 %v1191_v35, %v451_v41  ;;  %v464_v46 = vmul.f32 %v1196_v36, %v453_v42 }
  0xc3   : > { %v484_v47 = vpack.c.bf16 %v466_v44, %v464_v46  ;;  %v483_v48 = vpack.c.bf16 %v465_v43, %v463_v45 }
  0xc5   : > { %526 = vmatprep.subr.bf16.mxu0 %v484_v47 }
  0xc6   : > { %527 = vmatpush1.bf16.msra.mxu0 %v483_v48 }
  0xc9   : > { %543 = vmatmul.mubr.bf16.vlgmr.msra.gmra.mrb[0].mxu0 %v873_v49 }
  0xd0   : > { %v490_v52 = vpop.permute.xlu0 %489  ;;  %v495_v56 = vpop.permute.xlu1 %494 }
 0x19c   : > { %v544_v55 = vpop.f32.mrb[0].mxu0 }
 0x19d   : > { %v545_v57 = vadd.f32 %v544_v55, %v490_v52  ;;  %v546_v58 = vpop.f32.mrb[1].mxu0 }
 0x19e   : > { %v547_v59 = vadd.f32 %v546_v58, %v490_v52  ;;  %v548_v60 = vpop.f32.mrb[2].mxu0 }
 0x19f   : > { %v1213_v61 = vmax.f32 %v545_v57, 0.0  ;;  %v549_v62 = vadd.f32 %v548_v60, %v495_v56  ;;  %v550_v63 = vpop.f32.mrb[3].mxu0 }
 0x1a0   : > { %v551_v4 = vadd.f32 %v550_v63, %v495_v56  ;;  %v1219_v5 = vmax.f32 %v547_v59, 0.0 }
 0x1a1   : > { %v1215_v9 = vmax.f32 %v549_v62, 0.0  ;;  %557 = vrot.lane.b32.xlu1 %v1213_v61, %s887_s27 }
 0x1a2   : > { %v1221_v6 = vmax.f32 %v551_v4, 0.0 }
 0x1a3   : > { %559 = vrot.lane.b32.xlu0 %v1215_v9, %s887_s27  ;;  %v693_v11 = vpack.c.bf16 %v1215_v9, %v1213_v61 }
 0x1a4   : > { %v694_v14 = vpack.c.bf16 %v1221_v6, %v1219_v5 }
 0x1a5   : > { %573 = vrot.lane.b32.xlu1 %v1213_v61, %s888_s28 }
 0x1a7   : > { %575 = vrot.lane.b32.xlu0 %v1215_v9, %s888_s28 }
 0x1a9   : > { %589 = vrot.lane.b32.xlu1 %v1213_v61, %s889_s29 }
 0x1ab   : > { %591 = vrot.lane.b32.xlu0 %v1215_v9, %s889_s29 }
 0x1ad   : > { %605 = vrot.lane.b32.xlu1 %v1213_v61, %s890_s30 }
 0x1af   : > { %607 = vrot.lane.b32.xlu0 %v1215_v9, %s890_s30 }
 0x1b1   : > { %621 = vrot.lane.b32.xlu1 %v1213_v61, %s891_s7 }
 0x1b3   : > { %623 = vrot.lane.b32.xlu0 %v1215_v9, %s891_s7 }
 0x1b5   : > { %637 = vrot.lane.b32.xlu1 %v1213_v61, %s892_s8 }
 0x1b7   : > { %639 = vrot.lane.b32.xlu0 %v1215_v9, %s892_s8 }
 0x1b9   : > { %653 = vrot.lane.b32.xlu1 %v1213_v61, %s893_s9 }
 0x1bb   : > { %655 = vrot.lane.b32.xlu0 %v1215_v9, %s893_s9 }
 0x1bd   : > { %561 = vrot.lane.b32.xlu1 %v1219_v5, %s887_s27 }
 0x1bf   : > { %563 = vrot.lane.b32.xlu0 %v1221_v6, %s887_s27 }
 0x1c1   : > { %577 = vrot.lane.b32.xlu1 %v1219_v5, %s888_s28 }
 0x1c3   : > { %579 = vrot.lane.b32.xlu0 %v1221_v6, %s888_s28 }
 0x1c5   : > { %593 = vrot.lane.b32.xlu1 %v1219_v5, %s889_s29 }
 0x1c7   : > { %595 = vrot.lane.b32.xlu0 %v1221_v6, %s889_s29 }
 0x1c9   : > { %609 = vrot.lane.b32.xlu1 %v1219_v5, %s890_s30 }
 0x1cb   : > { %611 = vrot.lane.b32.xlu0 %v1221_v6, %s890_s30 }
 0x1cd   : > { %669 = vrot.lane.b32.xlu1 %v1213_v61, %s894_s12 }
 0x1cf   : > { %671 = vrot.lane.b32.xlu0 %v1215_v9, %s894_s12 }
 0x1d1   : > { %625 = vrot.lane.b32.xlu1 %v1219_v5, %s891_s7 }
 0x1d3   : > { %627 = vrot.lane.b32.xlu0 %v1221_v6, %s891_s7 }
 0x1d5   : > { %641 = vrot.lane.b32.xlu1 %v1219_v5, %s892_s8 }
 0x1d7   : > { %643 = vrot.lane.b32.xlu0 %v1221_v6, %s892_s8 }
 0x1d9   : > { %657 = vrot.lane.b32.xlu1 %v1219_v5, %s893_s9 }
 0x1db   : > { %659 = vrot.lane.b32.xlu0 %v1221_v6, %s893_s9 }
 0x1dd   : > { %673 = vrot.lane.b32.xlu1 %v1219_v5, %s894_s12 }
 0x1df   : > { %675 = vrot.lane.b32.xlu0 %v1221_v6, %s894_s12 }
 0x1e1   : > { %707 = vperm.xlu1 %872, %v703_v20  }
 0x1e3   : > { %712 = vperm.xlu0 %871, %v704_v21  }
 0x213   : > { %v558_v22 = vpop.permute.xlu1 %557 }
 0x215   : > { %v560_v23 = vpop.permute.xlu0 %559 }
 0x217   : > { %v574_v24 = vpop.permute.xlu1 %573 }
 0x219   : > { %v576_v12 = vpop.permute.xlu0 %575 }
 0x21b   : > { %v590_v13 = vpop.permute.xlu1 %589 }
 0x21d   : > { %v592_v25 = vpop.permute.xlu0 %591 }
 0x21f   : > { %v606_v26 = vpop.permute.xlu1 %605 }
 0x221   : > { %v608_v27 = vpop.permute.xlu0 %607 }
 0x223   : > { %v1299_v28 = vpop.permute.xlu1 %621 }
 0x225   : > { %v1301_v29 = vpop.permute.xlu0 %623 }
 0x227   : > { %v1303_v30 = vpop.permute.xlu1 %637 }
 0x229   : > { %v1305_v37 = vpop.permute.xlu0 %639 }
 0x22b   : > { %v1307_v38 = vpop.permute.xlu1 %653 }
 0x22d   : > { %v1309_v39 = vpop.permute.xlu0 %655 }
 0x22f   : > { %v562_v40 = vpop.permute.xlu1 %561 }
 0x230   : > { %v565_v41 = vsel %vm275_vm1, %v558_v22, %v562_v40  ;;  %v567_v42 = vsel %vm275_vm1, %v562_v40, %v558_v22 }
 0x231   : > { %v564_v43 = vpop.permute.xlu0 %563  ;;  %v569_v46 = vmul.f32 %v567_v42, %v1046_v16  ;;  %v570_v49 = vmul.f32 %v565_v41, %v1049_v17 }
 0x232   : > { %v566_v44 = vsel %vm275_vm1, %v560_v23, %v564_v43  ;;  %v568_v45 = vsel %vm275_vm1, %v564_v43, %v560_v23 }
 0x233   : > { %v571_v47 = vmul.f32 %v568_v45, %v1046_v16  ;;  %v578_v48 = vpop.permute.xlu1 %577  ;;  %v572_v52 = vmul.f32 %v566_v44, %v1049_v17 }
 0x234   : > { %v581_v55 = vsel %vm300_vm2, %v574_v24, %v578_v48  ;;  %v583_v56 = vsel %vm300_vm2, %v578_v48, %v574_v24 }
 0x235   : > { %v580_v57 = vpop.permute.xlu0 %579  ;;  %v686_v58 = vpack.c.bf16 %v572_v52, %v570_v49  ;;  %v685_v59 = vpack.c.bf16 %v571_v47, %v569_v46  ;;  %v585_v62 = vmul.f32 %v583_v56, %v1066_v33  ;;  %v586_v63 = vmul.f32 %v581_v55, %v1069_v34 }
 0x236   : > { %v582_v60 = vsel %vm300_vm2, %v576_v12, %v580_v57  ;;  %v584_v16 = vsel %vm300_vm2, %v580_v57, %v576_v12 }
 0x237   : > { %v587_v17 = vmul.f32 %v584_v16, %v1066_v33  ;;  %v588_v4 = vmul.f32 %v582_v60, %v1069_v34  ;;  %727 = vmatprep.subr.bf16.mxu1 %v686_v58  ;;  %v594_v19 = vpop.permute.xlu1 %593 }
 0x238   : > { %v597_v20 = vsel %vm325_vm3, %v590_v13, %v594_v19  ;;  %v599_v21 = vsel %vm325_vm3, %v594_v19, %v590_v13  ;;  %728 = vmatpush1.bf16.msra.mxu1 %v685_v59 }
 0x239   : > { %v596_v22 = vpop.permute.xlu0 %595  ;;  %v688_v23 = vpack.c.bf16 %v588_v4, %v586_v63  ;;  %v687_v24 = vpack.c.bf16 %v587_v17, %v585_v62  ;;  %v601_v34 = vmul.f32 %v599_v21, %v1086_v50  ;;  %v602_v40 = vmul.f32 %v597_v20, %v1089_v51 }
 0x23a   : > { %v598_v12 = vsel %vm325_vm3, %v592_v25, %v596_v22  ;;  %v600_v33 = vsel %vm325_vm3, %v596_v22, %v592_v25 }
 0x23b   : > { %v603_v41 = vmul.f32 %v600_v33, %v1086_v50  ;;  %v604_v42 = vmul.f32 %v598_v12, %v1089_v51  ;;  %729 = vmatprep.subr.bf16.mxu1 %v688_v23  ;;  %v610_v13 = vpop.permute.xlu1 %609 }
 0x23c   : > { %v613_v43 = vsel %vm350_vm4, %v606_v26, %v610_v13  ;;  %v615_v44 = vsel %vm350_vm4, %v610_v13, %v606_v26  ;;  %730 = vmatpush1.bf16.msra.mxu1 %v687_v24 }
 0x23d   : > { %v612_v45 = vpop.permute.xlu0 %611  ;;  %v690_v46 = vpack.c.bf16 %v604_v42, %v602_v40  ;;  %v689_v25 = vpack.c.bf16 %v603_v41, %v601_v34  ;;  %v617_v51 = vmul.f32 %v615_v44, %v1106_v7  ;;  %v618_v48 = vmul.f32 %v613_v43, %v1109_v8 }
 0x23e   : > { %v614_v47 = vsel %vm350_vm4, %v608_v27, %v612_v45  ;;  %v616_v50 = vsel %vm350_vm4, %v612_v45, %v608_v27 }
 0x23f   : > { %v619_v49 = vmul.f32 %v616_v50, %v1106_v7  ;;  %v620_v52 = vmul.f32 %v614_v47, %v1109_v8  ;;  %731 = vmatprep.subr.bf16.mxu1 %v690_v46  ;;  %v670_v26 = vpop.permute.xlu1 %669  ;;  %v876_v50 = vld [vmem:[%s1442_s2] ss:$8 sps:$4 sm:$0xff]  }
 0x240   : > { %732 = vmatpush1.bf16.msra.mxu1 %v689_v25 }
 0x241   : > { %v672_v55 = vpop.permute.xlu0 %671  ;;  %v692_v56 = vpack.c.bf16 %v620_v52, %v618_v48  ;;  %v691_v57 = vpack.c.bf16 %v619_v49, %v617_v51 }
 0x243   : > { %733 = vmatprep.subr.bf16.mxu1 %v692_v56  ;;  %v626_v58 = vpop.permute.xlu1 %625 }
 0x244   : > { %v629_v27 = vsel %vm375_vm5, %v1299_v28, %v626_v58  ;;  %v631_v59 = vsel %vm375_vm5, %v626_v58, %v1299_v28  ;;  %734 = vmatpush1.bf16.msra.mxu1 %v691_v57 }
 0x245   : > { %v628_v7 = vpop.permute.xlu0 %627  ;;  %735 = vmatprep.subr.bf16.mxu1 %v694_v14  ;;  %v633_v16 = vmul.f32 %v629_v27, %v1128_v31  ;;  %v634_v62 = vmul.f32 %v631_v59, %v1131_v32 }
 0x246   : > { %v630_v8 = vsel %vm375_vm5, %v1301_v29, %v628_v7  ;;  %v632_v60 = vsel %vm375_vm5, %v628_v7, %v1301_v29 }
 0x247   : > { %v635_v28 = vmul.f32 %v630_v8, %v1128_v31  ;;  %v636_v63 = vmul.f32 %v632_v60, %v1131_v32  ;;  %v642_v17 = vpop.permute.xlu1 %641 }
 0x248   : > { %v645_v5 = vsel %vm400_vm6, %v1303_v30, %v642_v17  ;;  %v647_v6 = vsel %vm400_vm6, %v642_v17, %v1303_v30  ;;  %736 = vmatpush1.bf16.msra.mxu1 %v693_v11 }
 0x249   : > { %v644_v14 = vpop.permute.xlu0 %643  ;;  %v696_v29 = vpack.c.bf16 %v636_v63, %v634_v62  ;;  %v695_v4 = vpack.c.bf16 %v635_v28, %v633_v16  ;;  %v649_v19 = vmul.f32 %v645_v5, %v1150_v53  ;;  %v650_v20 = vmul.f32 %v647_v6, %v1153_v54 }
 0x24a   : > { %v646_v31 = vsel %vm400_vm6, %v1305_v37, %v644_v14  ;;  %v648_v32 = vsel %vm400_vm6, %v644_v14, %v1305_v37 }
 0x24b   : > { %v651_v30 = vmul.f32 %v646_v31, %v1150_v53  ;;  %v652_v61 = vmul.f32 %v648_v32, %v1153_v54  ;;  %v658_v9 = vpop.permute.xlu1 %657  ;;  %737 = vmatprep.subr.bf16.mxu1 %v696_v29 }
 0x24c   : > { %v661_v11 = vsel %vm425_vm7, %v1307_v38, %v658_v9  ;;  %v663_v21 = vsel %vm425_vm7, %v658_v9, %v1307_v38  ;;  %738 = vmatpush1.bf16.msra.mxu1 %v695_v4 }
 0x24d   : > { %v660_v37 = vpop.permute.xlu0 %659  ;;  %v698_v22 = vpack.c.bf16 %v652_v61, %v650_v20  ;;  %v697_v23 = vpack.c.bf16 %v651_v30, %v649_v19  ;;  %v665_v24 = vmul.f32 %v661_v11, %v1170_v15  ;;  %v666_v12 = vmul.f32 %v663_v21, %v1173_v18 }
 0x24e   : > { %v662_v53 = vsel %vm425_vm7, %v1309_v39, %v660_v37  ;;  %v664_v54 = vsel %vm425_vm7, %v660_v37, %v1309_v39 }
 0x24f   : > { %v667_v33 = vmul.f32 %v662_v53, %v1170_v15  ;;  %v668_v38 = vmul.f32 %v664_v54, %v1173_v18  ;;  %v674_v34 = vpop.permute.xlu1 %673  ;;  %739 = vmatprep.subr.bf16.mxu1 %v698_v22 }
 0x250   : > { %v677_v40 = vsel %vm450_vm8, %v670_v26, %v674_v34  ;;  %v679_v41 = vsel %vm450_vm8, %v674_v34, %v670_v26  ;;  %740 = vmatpush1.bf16.msra.mxu1 %v697_v23 }
 0x251   : > { %v676_v42 = vpop.permute.xlu0 %675  ;;  %v700_v13 = vpack.c.bf16 %v668_v38, %v666_v12  ;;  %v699_v39 = vpack.c.bf16 %v667_v33, %v665_v24  ;;  %v681_v18 = vmul.f32 %v1191_v35, %v677_v40  ;;  %v682_v44 = vmul.f32 %v1196_v36, %v679_v41 }
 0x252   : > { %v678_v43 = vsel %vm450_vm8, %v672_v55, %v676_v42  ;;  %v680_v15 = vsel %vm450_vm8, %v676_v42, %v672_v55 }
 0x253   : > { %v683_v45 = vmul.f32 %v1191_v35, %v678_v43  ;;  %v684_v46 = vmul.f32 %v1196_v36, %v680_v15  ;;  %741 = vmatprep.subr.bf16.mxu1 %v700_v13 }
 0x254   : > { %742 = vmatpush1.bf16.msra.mxu1 %v699_v39 }
 0x255   : > { %v702_v25 = vpack.c.bf16 %v684_v46, %v682_v44  ;;  %v701_v47 = vpack.c.bf16 %v683_v45, %v681_v18 }
 0x257   : > { %743 = vmatprep.subr.bf16.mxu1 %v702_v25 }
 0x258   : > { %744 = vmatpush1.bf16.msra.mxu1 %v701_v47 }
 0x25b   : > { %760 = vmatmul.mubr.bf16.vlgmr.msra.gmra.mrb[0].mxu1 %v876_v50 }
 0x260   : > { %v708_v10 = vpop.permute.xlu1 %707 }
 0x262   : > { %v713_v52 = vpop.permute.xlu0 %712 }
 0x32e   : > { %v761_v51 = vpop.f32.mrb[0].mxu1 }
 0x32f   : > { %v762_v48 = vadd.f32 %v761_v51, %v708_v10  ;;  %v763_v49 = vpop.f32.mrb[1].mxu1 }
 0x330   : > { %v764_v35 = vadd.f32 %v763_v49, %v708_v10  ;;  %v765_v36 = vpop.f32.mrb[2].mxu1 }
 0x331   : > { %v770_v26 = vadd.f32 %v762_v48, %v949_v1  ;;  %v766_v55 = vadd.f32 %v765_v36, %v713_v52  ;;  %v767_v56 = vpop.f32.mrb[3].mxu1 }
 0x332   : > { %v771_v57 = vadd.f32 %v764_v35, %v947_v0  ;;  %v768_v58 = vadd.f32 %v767_v56, %v713_v52 }
 0x333   : > { %774 = vst [vmem:[%s251_s16] sm:$0xff] %v770_v26  ;;  %v772_v27 = vadd.f32 %v766_v55, %v957_v3 }
 0x334   : > { %775 = vst [vmem:[%s251_s16 + $0x8] sm:$0xff] %v771_v57  ;;  %v773_v59 = vadd.f32 %v768_v58, %v955_v2 }
 0x335   : > { %776 = vst [vmem:[%s251_s16 + $0x10] sm:$0xff] %v772_v27 }
 0x336   : > { %777 = vst [vmem:[%s251_s16 + $0x18] sm:$0xff] %v773_v59 }
 0x337 PF: > { %s16_s21 = sadd.s32 1, %s885_s21  }
 0x338   : > { %p13_p4 = scmp.ge.s32.totalorder %s16_s21, 4  }
 0x33a   :  { %15 = sbr.rel (!%p13_p4) target bundleno = 1 (0x1), region = 74 }

</bundles_post_ra>
